<compile_context>
chip_gen: v5e
topology: v5e:2x2
jax: 0.10.0
libtpu: 0.0.40
codegen_flags: <defaults>
</compile_context>

<pallas_src>
import functools

import jax
import jax.numpy as jnp
from jax.experimental import pallas as pl
from jax.experimental.pallas import tpu as pltpu


def _ae_kernel(x_ref, bias_ref, w_enc_ref, b_enc_ref, w_dec_ref,
               xhat_ref, f_ref, xc_ref, *scratch, compute_dtype, acc_in_out):
    """One (batch tile, dict tile) step: encode this H-slice, accumulate decode."""
    h = pl.program_id(1)
    nh = pl.num_programs(1)

    # Hoisted once per batch tile: center x and cast for the MXU.
    @pl.when(h == 0)
    def _():
        xc_ref[...] = (x_ref[...].astype(jnp.float32)
                       - bias_ref[...].astype(jnp.float32)).astype(compute_dtype)

    # encode slice: relu((x - bias) @ W_enc[:, h_tile] + b_enc[h_tile])
    pre = jnp.dot(xc_ref[...], w_enc_ref[...],
                  preferred_element_type=jnp.float32)          # (TB, TH) f32
    f = jnp.maximum(pre + b_enc_ref[...].astype(jnp.float32), 0.0)
    f_ref[...] = f.astype(f_ref.dtype)

    # decode partial: f[:, h_tile] @ W_dec[h_tile, :]
    partial = jnp.dot(f.astype(compute_dtype), w_dec_ref[...],
                      preferred_element_type=jnp.float32)      # (TB, D) f32
    bias = bias_ref[...].astype(jnp.float32)

    if acc_in_out:
        # x_hat output block is resident across h; accumulate in place (f32 output).
        @pl.when(h == 0)
        def _():
            xhat_ref[...] = partial + bias

        @pl.when(h != 0)
        def _():
            xhat_ref[...] += partial
    else:
        acc_ref = scratch[0]

        @pl.when(h == 0)
        def _():
            acc_ref[...] = partial + bias

        @pl.when(h != 0)
        def _():
            acc_ref[...] += partial

        @pl.when(h == nh - 1)
        def _():
            xhat_ref[...] = acc_ref[...].astype(xhat_ref.dtype)


def _pick_tile(dim, target, granule):
    """Largest divisor of `dim` that is <= target and a multiple of `granule`,
    falling back to the full dim (which always satisfies the (8,128) rule)."""
    if dim <= target:
        return dim
    t = (min(target, dim) // granule) * granule
    while t >= granule:
        if dim % t == 0:
            return t
        t -= granule
    return dim


def _tpu_limits():
    """(per-core VMEM bytes, TensorCores per chip) — best-effort chip detection."""
    kind = ""
    try:
        kind = (getattr(jax.devices()[0], "device_kind", "") or "").lower()
    except Exception:
        pass
    if "v7" in kind:
        return 64 << 20, 2      # v7x: 64 MiB VMEM per TC, 2 TCs/chip
    return 128 << 20, 1         # v5e / v6e: 128 MiB VMEM, 1 TC


def _vmem_estimate(TB, TH, D, xb, wb, fb, ob, acc_in_out):
    """Conservative VMEM requirement (every pipelined operand double-buffered)."""
    ins = 2 * (TB * D * xb + D * 4 + D * TH * wb + TH * 4 + TH * D * wb)
    outs = 2 * (TB * D * ob + TB * TH * fb)
    scr = TB * D * wb + (0 if acc_in_out else TB * D * 4)
    return ins + outs + scr


@functools.partial(jax.jit,
                   static_argnames=("block_b", "block_h", "compute_dtype", "f_dtype"))
def autoencoder_forward(x, bias, w_enc, b_enc, w_dec, *,
                        block_b=None, block_h=None,
                        compute_dtype=jnp.bfloat16, f_dtype=jnp.bfloat16):
    """Runs the AutoEncoder forward pass; returns (x_hat, f).

    x:      (B, D)      activations
    bias:   (D,)        decoder bias (pre-encode subtraction + post-decode add)
    w_enc:  (D, H)      encoder.weight.T
    b_enc:  (H,)        encoder bias
    w_dec:  (H, D)      decoder.weight.T (tied, column-normalized)
    """
    B, D = x.shape
    H = w_enc.shape[1]

    vmem_bytes, n_cores = _tpu_limits()
    vmem_budget = int(vmem_bytes * 0.85)

    xb = jnp.dtype(x.dtype).itemsize
    wb = jnp.dtype(compute_dtype).itemsize
    fb = jnp.dtype(f_dtype).itemsize
    ob = xb
    acc_in_out = jnp.dtype(x.dtype) == jnp.dtype(jnp.float32)

    # ---- batch tile selection ----
    if block_b is not None:
        TB = block_b
    else:
        tb_target = 256 if n_cores > 1 else 512          # smaller on v7x (64 MiB VMEM)
        TB = _pick_tile(B, tb_target, 8)
        if n_cores > 1 and B // TB < n_cores:            # keep >=1 batch tile per TC
            TB = _pick_tile(B, max(8, B // n_cores), 8)

    # ---- dict (feature) tile selection ----
    if block_h is not None:
        TH = block_h
    else:
        th_granule = 256 if H % 256 == 0 else 128        # fill the 2x256^2 MXU when possible
        # Prefer fully-resident weights (DMA'd exactly once) when they fit the budget.
        if _vmem_estimate(TB, H, D, xb, wb, fb, ob, acc_in_out) <= vmem_budget:
            TH = H
        else:
            th_target = 1024 if n_cores > 1 else 2048
            if n_cores > 1 and D >= 4096:
                th_target = 512
            TH = _pick_tile(H, th_target, th_granule)
            # Shrink tiles until the tiling fits the per-core VMEM budget.
            while _vmem_estimate(TB, TH, D, xb, wb, fb, ob, acc_in_out) > vmem_budget:
                new_th = _pick_tile(H, max(th_granule, TH // 2), th_granule)
                if new_th < TH:
                    TH = new_th
                    continue
                new_tb = _pick_tile(B, max(8, TB // 2), 8)
                if new_tb < TB:
                    TB = new_tb
                    continue
                break

    assert B % TB == 0 and (TB % 8 == 0 or TB == B)
    assert H % TH == 0 and (TH % 128 == 0 or TH == H)

    # Stream weights / matmul inputs in compute_dtype (bf16 by default);
    # biases stay f32 for the epilogue.
    w_enc = w_enc.astype(compute_dtype)
    w_dec = w_dec.astype(compute_dtype)
    bias2d = bias.reshape(1, D).astype(jnp.float32)
    b_enc2d = b_enc.reshape(1, H).astype(jnp.float32)

    est = _vmem_estimate(TB, TH, D, xb, wb, fb, ob, acc_in_out)
    vmem_limit = int(min(max(int(est * 1.3) + (8 << 20), 32 << 20), vmem_budget))

    grid = (B // TB, H // TH)
    out_shapes = (
        jax.ShapeDtypeStruct((B, D), x.dtype),   # x_hat
        jax.ShapeDtypeStruct((B, H), f_dtype),   # f (features)
    )
    scratch_shapes = [pltpu.VMEM((TB, D), compute_dtype)]      # centered-x scratch
    if not acc_in_out:
        scratch_shapes.append(pltpu.VMEM((TB, D), jnp.float32))  # x_hat accumulator

    kernel = functools.partial(_ae_kernel, compute_dtype=compute_dtype,
                               acc_in_out=acc_in_out)

    return pl.pallas_call(
        kernel,
        out_shape=out_shapes,
        grid_spec=pltpu.PrefetchScalarGridSpec(
            num_scalar_prefetch=0,
            grid=grid,
            in_specs=[
                pl.BlockSpec((TB, D), lambda i, h: (i, 0)),   # x tile (resident over h)
                pl.BlockSpec((1, D), lambda i, h: (0, 0)),    # decoder bias (shared)
                pl.BlockSpec((D, TH), lambda i, h: (0, h)),   # encoder weight slice
                pl.BlockSpec((1, TH), lambda i, h: (0, h)),   # encoder bias slice
                pl.BlockSpec((TH, D), lambda i, h: (h, 0)),   # decoder weight slice
            ],
            out_specs=[
                pl.BlockSpec((TB, D), lambda i, h: (i, 0)),   # x_hat tile (resident over h)
                pl.BlockSpec((TB, TH), lambda i, h: (i, h)),  # f tile
            ],
            scratch_shapes=scratch_shapes,
        ),
        compiler_params=pltpu.CompilerParams(
            dimension_semantics=("parallel", "arbitrary"),
            vmem_limit_bytes=vmem_limit),
    )(x, bias2d, w_enc, b_enc2d, w_dec)


def init_autoencoder_params(key, activation_dim, dict_size, dtype=jnp.float32):
    """Deterministic synthetic init mirroring AutoEncoder.__init__ (tied=True)."""
    k_w, k_b = jax.random.split(key)
    bound_w = 1.0 / jnp.sqrt(activation_dim)
    enc_weight = jax.random.uniform(k_w, (dict_size, activation_dim),
                                    minval=-bound_w, maxval=bound_w, dtype=dtype)
    enc_bias = jax.random.uniform(k_b, (dict_size,),
                                  minval=-bound_w, maxval=bound_w, dtype=dtype)
    bias = jnp.zeros((activation_dim,), dtype=dtype)
    # tied decoder: dec_weight = enc_weight.T, normalized along dim=0
    dec_weight = enc_weight.T
    dec_weight = dec_weight / jnp.linalg.norm(dec_weight, axis=0, keepdims=True)
    return {
        "bias": bias,
        "w_enc": enc_weight.T,                 # (activation_dim, dict_size)
        "b_enc": enc_bias,
        "w_dec": dec_weight.T,                 # (dict_size, activation_dim)
    }


def reference_forward(x, params):
    """Pure-JAX f32 reference matching the PyTorch forward (output_features=True)."""
    f = jax.nn.relu((x - params["bias"]) @ params["w_enc"] + params["b_enc"])
    x_hat = f @ params["w_dec"] + params["bias"]
    return x_hat, f


# TODO(synk): mask / ghost_mask branches of AutoEncoder.forward are not implemented
# (default forward path only).

if __name__ == "__main__":
    activation_dim = 128
    dict_size = 512
    batch = 256

    key = jax.random.PRNGKey(0)
    k_params, k_x = jax.random.split(key)

    params = init_autoencoder_params(k_params, activation_dim, dict_size)
    x = jax.random.normal(k_x, (batch, activation_dim), dtype=jnp.float32)

    # Explicit tiles: 2 batch tiles x 2 dict tiles — exercises the megacore split,
    # the hoisted-centering scratch, and the in-place x_hat accumulation over h.
    x_hat, f = autoencoder_forward(
        x,
        params["bias"],
        params["w_enc"],
        params["b_enc"],
        params["w_dec"],
        block_b=128,
        block_h=256,
    )
    jax.block_until_ready((x_hat, f))

    # Correctness against the pure-JAX f32 reference (bf16 matmul inputs + bf16 f
    # output → relaxed tolerances).
    x_hat_ref, f_ref_arr = reference_forward(x, params)
    assert jnp.allclose(x_hat, x_hat_ref, atol=5e-2, rtol=5e-2), "x_hat mismatch"
    assert jnp.allclose(f.astype(jnp.float32), f_ref_arr, atol=5e-2, rtol=5e-2), "f mismatch"

    # Auto-tiled path (heuristic TB/TH selection, weights-resident when they fit).
    x_hat2, f2 = autoencoder_forward(
        x, params["bias"], params["w_enc"], params["b_enc"], params["w_dec"])
    jax.block_until_ready((x_hat2, f2))
    assert jnp.allclose(x_hat2, x_hat_ref, atol=5e-2, rtol=5e-2), "auto-tiled x_hat mismatch"
    assert jnp.allclose(f2.astype(jnp.float32), f_ref_arr, atol=5e-2, rtol=5e-2), \
        "auto-tiled f mismatch"

    print("KERNEL_OK")
</pallas_src>

<mosaic_0001>
module attributes {stable_mosaic.version = 11 : i64} {
  func.func @_ae_kernel(%arg0: i32, %arg1: i32, %arg2: memref<128x128xf32, #tpu.memory_space<vmem>>, %arg3: memref<1x128xf32, #tpu.memory_space<vmem>>, %arg4: memref<128x256xbf16, #tpu.memory_space<vmem>>, %arg5: memref<1x256xf32, #tpu.memory_space<vmem>>, %arg6: memref<256x128xbf16, #tpu.memory_space<vmem>>, %arg7: memref<128x128xf32, #tpu.memory_space<vmem>>, %arg8: memref<128x256xbf16, #tpu.memory_space<vmem>>, %arg9: memref<128x128xbf16, #tpu.memory_space<vmem>>) attributes {dimension_semantics = [#tpu.dimension_semantics<parallel>, #tpu.dimension_semantics<arbitrary>], iteration_bounds = array<i64: 2, 2>, scalar_prefetch = 0 : i64, scratch_operands = 1 : i64, tpu.core_type = #tpu.core_type<tc>, window_params = [{transform_indices = @transform_0, window_bounds = array<i64: 128, 128>}, {pipeline_mode = #tpu.pipeline_mode<synchronous>, transform_indices = @transform_1, window_bounds = array<i64: 1, 128>}, {transform_indices = @transform_2, window_bounds = array<i64: 128, 256>}, {transform_indices = @transform_3, window_bounds = array<i64: 1, 256>}, {transform_indices = @transform_4, window_bounds = array<i64: 256, 128>}, {transform_indices = @transform_5, window_bounds = array<i64: 128, 128>}, {transform_indices = @transform_6, window_bounds = array<i64: 128, 256>}]} {
    %c0_i32 = arith.constant 0 : i32
    %0 = arith.cmpi eq, %arg1, %c0_i32 : i32
    %1 = arith.extui %0 : i1 to i32
    %c0_i32_0 = arith.constant 0 : i32
    %2 = arith.cmpi ne, %1, %c0_i32_0 : i32
    scf.if %2 {
      %c0_18 = arith.constant 0 : index
      %c0_19 = arith.constant 0 : index
      %23 = vector.load %arg2[%c0_18, %c0_19] : memref<128x128xf32, #tpu.memory_space<vmem>>, vector<128x128xf32>
      %c0_20 = arith.constant 0 : index
      %c0_21 = arith.constant 0 : index
      %24 = vector.load %arg3[%c0_20, %c0_21] : memref<1x128xf32, #tpu.memory_space<vmem>>, vector<1x128xf32>
      %25 = vector.broadcast %24 : vector<1x128xf32> to vector<128x128xf32>
      %26 = arith.subf %23, %25 : vector<128x128xf32>
      %27 = arith.truncf %26 : vector<128x128xf32> to vector<128x128xbf16>
      %c0_22 = arith.constant 0 : index
      %c0_23 = arith.constant 0 : index
      %28 = vector.load %arg9[%c0_22, %c0_23] : memref<128x128xbf16, #tpu.memory_space<vmem>>, vector<128x128xbf16>
      tpu.vector_store %arg9[%c0_22, %c0_23], %27 {strides = array<i32>} : memref<128x128xbf16, #tpu.memory_space<vmem>>, vector<128x128xbf16>,
    } else {
    }
    %c0 = arith.constant 0 : index
    %c0_1 = arith.constant 0 : index
    %3 = vector.load %arg9[%c0, %c0_1] : memref<128x128xbf16, #tpu.memory_space<vmem>>, vector<128x128xbf16>
    %c0_2 = arith.constant 0 : index
    %c0_3 = arith.constant 0 : index
    %4 = vector.load %arg4[%c0_2, %c0_3] : memref<128x256xbf16, #tpu.memory_space<vmem>>, vector<128x256xbf16>
    %cst = arith.constant dense<0.000000e+00> : vector<128x256xf32>
    %5 = tpu.matmul %3, %4, %cst {dimension_numbers = #tpu.dot_dimension_numbers<[1], [0], [0], [1], [0, 0, 1, 1], [], []>} : vector<128x128xbf16>, vector<128x256xbf16>, vector<128x256xf32> -> vector<128x256xf32>
    %c0_4 = arith.constant 0 : index
    %c0_5 = arith.constant 0 : index
    %6 = vector.load %arg5[%c0_4, %c0_5] : memref<1x256xf32, #tpu.memory_space<vmem>>, vector<1x256xf32>
    %7 = vector.broadcast %6 : vector<1x256xf32> to vector<128x256xf32>
    %8 = arith.addf %5, %7 : vector<128x256xf32>
    %cst_6 = arith.constant 0.000000e+00 : f32
    %9 = vector.broadcast %cst_6 : f32 to vector<128x256xf32>
    %10 = arith.maximumf %8, %9 : vector<128x256xf32>
    %11 = arith.truncf %10 : vector<128x256xf32> to vector<128x256xbf16>
    %c0_7 = arith.constant 0 : index
    %c0_8 = arith.constant 0 : index
    %12 = vector.load %arg8[%c0_7, %c0_8] : memref<128x256xbf16, #tpu.memory_space<vmem>>, vector<128x256xbf16>
    tpu.vector_store %arg8[%c0_7, %c0_8], %11 {strides = array<i32>} : memref<128x256xbf16, #tpu.memory_space<vmem>>, vector<128x256xbf16>,
    %13 = arith.truncf %10 : vector<128x256xf32> to vector<128x256xbf16>
    %c0_9 = arith.constant 0 : index
    %c0_10 = arith.constant 0 : index
    %14 = vector.load %arg6[%c0_9, %c0_10] : memref<256x128xbf16, #tpu.memory_space<vmem>>, vector<256x128xbf16>
    %cst_11 = arith.constant dense<0.000000e+00> : vector<128x128xf32>
    %15 = tpu.matmul %13, %14, %cst_11 {dimension_numbers = #tpu.dot_dimension_numbers<[1], [0], [0], [1], [0, 0, 1, 1], [], []>} : vector<128x256xbf16>, vector<256x128xbf16>, vector<128x128xf32> -> vector<128x128xf32>
    %c0_12 = arith.constant 0 : index
    %c0_13 = arith.constant 0 : index
    %16 = vector.load %arg3[%c0_12, %c0_13] : memref<1x128xf32, #tpu.memory_space<vmem>>, vector<1x128xf32>
    %c0_i32_14 = arith.constant 0 : i32
    %17 = arith.cmpi eq, %arg1, %c0_i32_14 : i32
    %18 = arith.extui %17 : i1 to i32
    %c0_i32_15 = arith.constant 0 : i32
    %19 = arith.cmpi ne, %18, %c0_i32_15 : i32
    scf.if %19 {
      %23 = vector.broadcast %16 : vector<1x128xf32> to vector<128x128xf32>
      %24 = arith.addf %15, %23 : vector<128x128xf32>
      %c0_18 = arith.constant 0 : index
      %c0_19 = arith.constant 0 : index
      %25 = vector.load %arg7[%c0_18, %c0_19] : memref<128x128xf32, #tpu.memory_space<vmem>>, vector<128x128xf32>
      tpu.vector_store %arg7[%c0_18, %c0_19], %24 {strides = array<i32>} : memref<128x128xf32, #tpu.memory_space<vmem>>, vector<128x128xf32>,
    } else {
    }
    %c0_i32_16 = arith.constant 0 : i32
    %20 = arith.cmpi ne, %arg1, %c0_i32_16 : i32
    %21 = arith.extui %20 : i1 to i32
    %c0_i32_17 = arith.constant 0 : i32
    %22 = arith.cmpi ne, %21, %c0_i32_17 : i32
    scf.if %22 {
      %c0_18 = arith.constant 0 : index
      %c0_19 = arith.constant 0 : index
      %23 = vector.load %arg7[%c0_18, %c0_19] : memref<128x128xf32, #tpu.memory_space<vmem>>, vector<128x128xf32>
      %24 = arith.addf %23, %15 : vector<128x128xf32>
      %c0_20 = arith.constant 0 : index
      %c0_21 = arith.constant 0 : index
      %25 = vector.load %arg7[%c0_20, %c0_21] : memref<128x128xf32, #tpu.memory_space<vmem>>, vector<128x128xf32>
      tpu.vector_store %arg7[%c0_20, %c0_21], %24 {strides = array<i32>} : memref<128x128xf32, #tpu.memory_space<vmem>>, vector<128x128xf32>,
    } else {
    }
    return
  }
  func.func @transform_0(%arg0: i32, %arg1: i32) -> (i32, i32) {
    %c0_i32 = arith.constant 0 : i32
    %c0_i32_0 = arith.constant 0 : i32
    return %arg0, %c0_i32 : i32, i32
  }
  func.func @transform_1(%arg0: i32, %arg1: i32) -> (i32, i32) {
    %c0_i32 = arith.constant 0 : i32
    %c0_i32_0 = arith.constant 0 : i32
    %c0_i32_1 = arith.constant 0 : i32
    return %c0_i32, %c0_i32_0 : i32, i32
  }
  func.func @transform_2(%arg0: i32, %arg1: i32) -> (i32, i32) {
    %c0_i32 = arith.constant 0 : i32
    %c0_i32_0 = arith.constant 0 : i32
    return %c0_i32, %arg1 : i32, i32
  }
  func.func @transform_3(%arg0: i32, %arg1: i32) -> (i32, i32) {
    %c0_i32 = arith.constant 0 : i32
    %c0_i32_0 = arith.constant 0 : i32
    return %c0_i32, %arg1 : i32, i32
  }
  func.func @transform_4(%arg0: i32, %arg1: i32) -> (i32, i32) {
    %c0_i32 = arith.constant 0 : i32
    %c0_i32_0 = arith.constant 0 : i32
    return %arg1, %c0_i32 : i32, i32
  }
  func.func @transform_5(%arg0: i32, %arg1: i32) -> (i32, i32) {
    %c0_i32 = arith.constant 0 : i32
    %c0_i32_0 = arith.constant 0 : i32
    return %arg0, %c0_i32 : i32, i32
  }
  func.func @transform_6(%arg0: i32, %arg1: i32) -> (i32, i32) {
    %c0_i32 = arith.constant 0 : i32
    return %arg0, %arg1 : i32, i32
  }
}

</mosaic_0001>

<bundles_post_ra>
// kernel: autoencoder_forward.1
= control target key start
LH: loop header
LB: loop body
LE: loop exit
PB: predicated region body
PF: predicated region fallthrough
CT: control target
= control target key end

     0   :  { %s2557_s0 = inlined_call_operand.vmem [shape: f32[256,128], index: 0, kind: input, shape index: {}]   ;;  %s2558_s1 = inlined_call_operand.vmem [shape: f32[1,128], index: 1, kind: input, shape index: {}]   ;;  %s2559_s2 = inlined_call_operand.vmem [shape: bf16[128,512], index: 2, kind: input, shape index: {}]   ;;  %s2560_s3 = inlined_call_operand.vmem [shape: f32[1,512], index: 3, kind: input, shape index: {}]   ;;  %s2561_s4 = inlined_call_operand.vmem [shape: bf16[512,128], index: 4, kind: input, shape index: {}]   ;;  %s2562_s5 = inlined_call_operand.hbm [shape: f32[256,128], index: 5, kind: output, shape index: {0}]   ;;  %s2563_s6 = inlined_call_operand.hbm [shape: bf16[256,512], index: 6, kind: output, shape index: {1}]  }
   0x1   :  { %2578 = sst [smem:[#allocation24_spill]] %s2557_s0 }
   0x2   :  { %2579 = sst [smem:[#allocation25_spill]] %s2559_s2 }
   0x3   :  { %2580 = sst [smem:[#allocation26_spill]] %s2563_s6 }
   0x4   :  { %12 = vsyncpa [#allocation5], 0 }
   0x5   :  { %14 = vsyncpa [#allocation5 + $0x1], 0 }
   0x6   :  { %15 = vsyncpa [#allocation7], 0 }
   0x7   :  { %17 = vsyncpa [#allocation7 + $0x1], 0  ;;  %s2029_s21 = smov 0   ;;  %s2031_s22 = smov 0  }
   0x8   :  { %s2033_s23 = smov 0   ;;  %s2035_s24 = smov 0  }
   0x9   :  { %s2037_s25 = smov 0   ;;  %s2039_s26 = smov 0  }
   0xa   :  { %s2041_s27 = smov 0   ;;  %s2043_s28 = smov 0  }
   0xb   :  { %s2045_s29 = smov 0   ;;  %s2047_s30 = smov 0  }
   0xc   :  { %s2049_s7 = smov 0   ;;  %s2051_s8 = smov 0  }
   0xd   :  { %s2053_s9 = smov 0  }
   0xe LB: > { %2581 = sst [smem:[#allocation10_spill]] %s1941_s21  ;;  %s1424_s10 = sadd.s32 4294967295, %s1989_s9   ;;  %s1989_s9 = sphi %s2053_s9, %s23_s9   ;;  %s1985_s8 = sphi %s2051_s8, %s2621_s8   ;;  %s1981_s7 = sphi %s2049_s7, %s2628_s7   ;;  %s1977_s30 = sphi %s2047_s30, %s2619_s30   ;;  %s1973_s29 = sphi %s2045_s29, %s2627_s29   ;;  %s1969_s28 = sphi %s2043_s28, %s2617_s28   ;;  %s1965_s27 = sphi %s2041_s27, %s2616_s27   ;;  %s1961_s26 = sphi %s2039_s26, %s2615_s26   ;;  %s1957_s25 = sphi %s2037_s25, %s2626_s25   ;;  %s1953_s24 = sphi %s2035_s24, %s2625_s24   ;;  %s1949_s23 = sphi %s2033_s23, %s2613_s23   ;;  %s1945_s22 = sphi %s2031_s22, %s2624_s22   ;;  %s1941_s21 = sphi %s2029_s21, %s2623_s21  }
   0xf   : > { %2582 = sst [smem:[#allocation11_spill]] %s1949_s23  ;;  %s1425_s11 = sadd.s32 4294967294, %s1989_s9  }
  0x10   : > { %2583 = sst [smem:[#allocation12_spill]] %s1953_s24  ;;  %s32_s12 = sadd.s32 1, %s1981_s7 }
  0x11   : > { %2584 = sst [smem:[#allocation13_spill]] %s1961_s26  ;;  %s35_s13 = sadd.s32 1, %s1985_s8 }
  0x12   : > { %2585 = sst [smem:[#allocation14_spill]] %s1969_s28  ;;  %p33_p0 = scmp.ge.s32.totalorder %s32_s12, 2 }
  0x13   : > { %2586 = sst [smem:[#allocation15_spill]] %s1981_s7  ;;  %s89_s14 = sadd.s32 1, %s1969_s28 }
  0x14   : > { %2587 = sst [smem:[#allocation16_spill]] %s1985_s8  ;;  %p96_p1 = scmp.ne.s32.totalorder %s1969_s28, %s1965_s27 }
  0x15   : > { %p97_p2 = scmp.eq.s32.totalorder %s1989_s9, 0  ;;  %s2630_s12 = smov (%p33_p0, %s32_s12), 0 }
  0x16   : > { %2588 = sst [smem:[#allocation17_spill]] %s2630_s12  ;;  %s2632_s13 = smov (!%p33_p0, %s35_s13), %s1985_s8 }
  0x17   : > { %s86_s15 = ssub.s32 %s1981_s7, %s2630_s12  ;;  %p2107_p3 = por %p97_p2, %p96_p1 }
  0x18   : > { %p37_p4 = scmp.ge.s32.totalorder %s2632_s13, 2  ;;  %p87_p5 = scmp.eq.s32.totalorder %s86_s15, 0 }
  0x19   : > { %s167_s17 = sadd.s32 1, %s1961_s26  ;;  %p177_p6 = scmp.ne.s32.totalorder %s1961_s26, %s1957_s25 }
  0x1a   : > { %s2634_s13 = smov (%p37_p4, %s2632_s13), 0  ;;  %p2121_p7 = scmp.eq.s32.totalorder %s1424_s10, 3 }
  0x1b   : > { %2590 = sst [smem:[#allocation18_spill]] %s2634_s13  ;;  %s164_s19 = ssub.s32 %s1985_s8, %s2634_s13 }
  0x1c   : > { %s2117_s18 = scalar_select %p87_p5, %s1969_s28, %s89_s14  }
  0x1d   : > { %p165_p8 = scmp.eq.s32.totalorder %s164_s19, 0  ;;  %p183_p9 = scmp.ne.s32.totalorder %s1957_s25, %s1953_s24 }
  0x1e   : > { %2591 = sst [smem:[#allocation19_spill]] %s2117_s18  ;;  %p2129_p10 = por %p2121_p7, %p177_p6 }
  0x1f   : > { %p184_p11 = scmp.eq.s32.totalorder %s1425_s11, 3  ;;  %s192_s10 = sor.u32 %s164_s19, %s86_s15 }
  0x20   : > { %s2134_s6 = scalar_select %p165_p8, %s1961_s26, %s167_s17  }
  0x21   : > { %p2136_p12 = por %p184_p11, %p183_p9  ;;  %p193_p13 = scmp.eq.s32.totalorder %s192_s10, 0 }
  0x22   : > { %2594 = sst [smem:[#allocation20_spill]] %s2134_s6  ;;  %s195_s13 = sadd.s32 1, %s1949_s23 }
  0x23   : > { %s2595_s14 = scalar_select %p2136_p12, 1, 0 }
  0x24   : > { %p205_p0 = scmp.ne.s32.totalorder %s1949_s23, %s1945_s22  ;;  %p211_p1 = scmp.ne.s32.totalorder %s1945_s22, %s1941_s21 }
  0x25   : > { %2596 = sst [smem:[#allocation21_spill]] %s2595_s14  ;;  %p1427_p5 = scmp.ge.s32.totalorder %s1989_s9, 4 }
  0x26   : > { %s2146_s8 = scalar_select %p193_p13, %s1949_s23, %s195_s13  }
  0x27   : > { %p2150_p2 = por %p205_p0, %p2121_p7  ;;  %p2154_p4 = por %p211_p1, %p184_p11 }
  0x28   : > { %2597 = sst [smem:[#allocation22_spill]] %s2146_s8  ;;  %231 = sbr.rel (%p1427_p5) target bundleno = 71 (0x47), region = 20 }
  0x29   : > { %s2599_s11 = scalar_select %p2154_p4, 1, 0 }
  0x2b   : > { %2600 = sst [smem:[#allocation23_spill]] %s2599_s11 }
  0x2d   : > { %243 = sbr.rel (!%p2107_p3) target bundleno = 71 (0x47), region = 28  ;;  %s245_s15 = sand.u32 (%p2107_p3), 1, %s1969_s28  }
  0x2e   : > { %s1613_s13 = sshll.u32 (%p2107_p3), %s1981_s7, 3  ;;  %s1428_s17 = sshll.u32 (%p2107_p3), %s245_s15, 7 }
  0x2f   : > { %s2601_s2 = sld [smem:[#allocation25_spill]] (%p2107_p3)  ;;  %s247_s16 = scalar_lea.vmem (%p2107_p3), [#allocation3], %s1428_s17 }
  0x35   : > { %s2166_s10 = scalar_lea.vmem %s2601_s2, %s1613_s13 }
  0x36   : > { %v309_v0 = vld [vmem:[%s2166_s10] sm:$0xff]  ;;  %v311_v1 = vld [vmem:[%s2166_s10 + $0x10] sm:$0xff] }
  0x37   : > { %v313_v2 = vld [vmem:[%s2166_s10 + $0x20] sm:$0xff]  ;;  %310 = vst [vmem:[%s247_s16] sm:$0xff] %v309_v0  ;;  %v315_v3 = vld [vmem:[%s2166_s10 + $0x30] sm:$0xff] }
  0x38   : > { %312 = vst [vmem:[%s247_s16 + $0x8] sm:$0xff] %v311_v1  ;;  %v317_v4 = vld [vmem:[%s2166_s10 + $0x40] sm:$0xff]  ;;  %v319_v5 = vld [vmem:[%s2166_s10 + $0x50] sm:$0xff] }
  0x39   : > { %314 = vst [vmem:[%s247_s16 + $0x10] sm:$0xff] %v313_v2  ;;  %v321_v6 = vld [vmem:[%s2166_s10 + $0x60] sm:$0xff]  ;;  %v323_v7 = vld [vmem:[%s2166_s10 + $0x70] sm:$0xff] }
  0x3a   : > { %316 = vst [vmem:[%s247_s16 + $0x18] sm:$0xff] %v315_v3  ;;  %v325_v8 = vld [vmem:[%s2166_s10 + $0x80] sm:$0xff]  ;;  %v327_v9 = vld [vmem:[%s2166_s10 + $0x90] sm:$0xff] }
  0x3b   : > { %318 = vst [vmem:[%s247_s16 + $0x20] sm:$0xff] %v317_v4  ;;  %v329_v10 = vld [vmem:[%s2166_s10 + $0xa0] sm:$0xff]  ;;  %v331_v11 = vld [vmem:[%s2166_s10 + $0xb0] sm:$0xff] }
  0x3c   : > { %320 = vst [vmem:[%s247_s16 + $0x28] sm:$0xff] %v319_v5  ;;  %v333_v12 = vld [vmem:[%s2166_s10 + $0xc0] sm:$0xff]  ;;  %v335_v13 = vld [vmem:[%s2166_s10 + $0xd0] sm:$0xff] }
  0x3d   : > { %322 = vst [vmem:[%s247_s16 + $0x30] sm:$0xff] %v321_v6  ;;  %v337_v14 = vld [vmem:[%s2166_s10 + $0xe0] sm:$0xff]  ;;  %v339_v15 = vld [vmem:[%s2166_s10 + $0xf0] sm:$0xff] }
  0x3e   : > { %324 = vst [vmem:[%s247_s16 + $0x38] sm:$0xff] %v323_v7 }
  0x3f   : > { %326 = vst [vmem:[%s247_s16 + $0x40] sm:$0xff] %v325_v8 }
  0x40   : > { %328 = vst [vmem:[%s247_s16 + $0x48] sm:$0xff] %v327_v9 }
  0x41   : > { %330 = vst [vmem:[%s247_s16 + $0x50] sm:$0xff] %v329_v10 }
  0x42   : > { %332 = vst [vmem:[%s247_s16 + $0x58] sm:$0xff] %v331_v11 }
  0x43   : > { %334 = vst [vmem:[%s247_s16 + $0x60] sm:$0xff] %v333_v12 }
  0x44   : > { %336 = vst [vmem:[%s247_s16 + $0x68] sm:$0xff] %v335_v13 }
  0x45   : > { %338 = vst [vmem:[%s247_s16 + $0x70] sm:$0xff] %v337_v14 }
  0x46   : > { %340 = vst [vmem:[%s247_s16 + $0x78] sm:$0xff] %v339_v15 }
  0x47 PF: > { %p1431_p3 = scmp.ge.s32.totalorder %s1989_s9, 1  ;;  %p362_p6 = scmp.lt.s32.totalorder %s1989_s9, 5 }
  0x49   : > { %p363_p7 = pnand %p1431_p3, %p362_p6 }
  0x4a   : > { %s369_s15 = sand.u32 (!%p363_p7), 1, %s1965_s27   ;;  %s2570_s13 = sand.u32 (!%p363_p7), 1, %s1957_s25  }
  0x4b   : > { %366 = sbr.rel (%p363_p7) target bundleno = 623 (0x26f), region = 74  ;;  %s1432_s17 = sshll.u32 (!%p363_p7), %s369_s15, 7 }
  0x4c   : > { %s1433_s19 = sshll.u32 (!%p363_p7), %s2570_s13, 7  ;;  %s2571_s20 = sand.u32 (!%p363_p7), 1, %s1945_s22  }
  0x4d   : > { %s1435_s10 = sshll.u32 (!%p363_p7), %s1977_s30, 4  ;;  %s1434_s16 = sshll.u32 (!%p363_p7), %s2571_s20, 7 }
  0x4e   : > { %p418_p8 = scmp.lt.s32.totalorder (!%p363_p7), %s1435_s10, 31  ;;  %s2195_s2 = sshll.u32 (!%p363_p7), %s1973_s29, 1 }
  0x4f   : > { %p425_p9 = scmp.lt.s32.totalorder (!%p363_p7), %s2195_s2, 3  ;;  %s1438_s7 = sshll.u32 (!%p363_p7), %s1973_s29, 5 }
  0x50   : > { %s2636_s10 = smov (!%p418_p8, %s1435_s10), 31  ;;  %p430_p11 = scmp.lt.s32.totalorder %s1438_s7, 63 }
  0x51   : > { %s1436_s28 = sshll.u32 %s2636_s10, 3  ;;  %s2602_s0 = sld [smem:[#allocation24_spill]] }
  0x52   : > { %s2205_s13 = scalar_select %p425_p9, %s2195_s2, 3 }
  0x53   : > { %s2638_s7 = smov (!%p430_p11, %s1438_s7), 63  ;;  %s2216_s10 = scalar_lea.vmem [#allocation3], %s1432_s17 }
  0x54   : > { %s427_s8 = scalar_lea.vmem %s2560_s3, %s2205_s13  ;;  %s1439_s23 = sshll.u32 %s2638_s7, 2 }
  0x55   : > { %s2214_s14 = scalar_lea.vmem %s2561_s4, %s1439_s23  ;;  %s2218_s24 = scalar_lea.vmem [#allocation4], %s1433_s19 }
  0x56   : > { %s2220_s6 = scalar_lea.vmem [#allocation6], %s1434_s16  ;;  %p1440_p13 = scmp.ne.s32.totalorder %s1973_s29, 0 }
  0x57   : > { %s2202_s15 = scalar_lea.vmem %s2602_s0, %s1436_s28 }
  0x58   : > { %441 = sbr.rel (%p1440_p13) target bundleno = 107 (0x6b), region = 82 }
  0x5d   : > { %v442_v16 = vld [vmem:[%s2202_s15] sm:$0xff]  ;;  %v443_v17 = vld [vmem:[%s2202_s15 + $0x8] sm:$0xff]  ;;  %v444_v19 = vld [vmem:[%s2202_s15 + $0x10] sm:$0xff] }
  0x5e   : > { %v1822_v18 = vld [vmem:[%s2558_s1] ss:$0 sm:$0xff]  ;;  %v445_v20 = vld [vmem:[%s2202_s15 + $0x18] sm:$0xff]  ;;  %v447_v22 = vld [vmem:[%s2202_s15 + $0x28] sm:$0xff] }
  0x5f   : > { %v446_v21 = vld [vmem:[%s2202_s15 + $0x20] sm:$0xff]  ;;  %v448_v23 = vld [vmem:[%s2202_s15 + $0x30] sm:$0xff]  ;;  %v462_v24 = vsub.f32 %v442_v16, %v1822_v18  ;;  %v463_v25 = vsub.f32 %v443_v17, %v1822_v18  ;;  %v464_v26 = vsub.f32 %v444_v19, %v1822_v18  ;;  %v465_v27 = vsub.f32 %v445_v20, %v1822_v18  ;;  %v449_v28 = vld [vmem:[%s2202_s15 + $0x38] sm:$0xff] }
  0x60   : > { %v450_v29 = vld [vmem:[%s2202_s15 + $0x40] sm:$0xff]  ;;  %v451_v30 = vld [vmem:[%s2202_s15 + $0x48] sm:$0xff]  ;;  %v466_v31 = vsub.f32 %v446_v21, %v1822_v18  ;;  %v467_v32 = vsub.f32 %v447_v22, %v1822_v18  ;;  %v468_v33 = vsub.f32 %v448_v23, %v1822_v18  ;;  %v469_v34 = vsub.f32 %v449_v28, %v1822_v18  ;;  %v452_v35 = vld [vmem:[%s2202_s15 + $0x50] sm:$0xff] }
  0x61   : > { %v453_v36 = vld [vmem:[%s2202_s15 + $0x58] sm:$0xff]  ;;  %v454_v37 = vld [vmem:[%s2202_s15 + $0x60] sm:$0xff]  ;;  %v1659_v38 = vpack.c.bf16 %v463_v25, %v462_v24  ;;  %v1664_v39 = vpack.c.bf16 %v465_v27, %v464_v26  ;;  %v470_v40 = vsub.f32 %v450_v29, %v1822_v18  ;;  %v471_v41 = vsub.f32 %v451_v30, %v1822_v18  ;;  %v455_v42 = vld [vmem:[%s2202_s15 + $0x68] sm:$0xff] }
  0x62   : > { %v456_v43 = vld [vmem:[%s2202_s15 + $0x70] sm:$0xff]  ;;  %v457_v44 = vld [vmem:[%s2202_s15 + $0x78] sm:$0xff]  ;;  %v1669_v45 = vpack.c.bf16 %v467_v32, %v466_v31  ;;  %v1674_v46 = vpack.c.bf16 %v469_v34, %v468_v33  ;;  %v472_v47 = vsub.f32 %v452_v35, %v1822_v18  ;;  %v473_v48 = vsub.f32 %v453_v36, %v1822_v18 }
  0x63   : > { %1660 = vst [vmem:[#allocation2 + $0x30] sm:$0xff] %v1659_v38   ;;  %v1679_v49 = vpack.c.bf16 %v471_v41, %v470_v40  ;;  %v474_v50 = vsub.f32 %v454_v37, %v1822_v18  ;;  %v475_v51 = vsub.f32 %v455_v42, %v1822_v18  ;;  %v476_v52 = vsub.f32 %v456_v43, %v1822_v18 }
  0x64   : > { %1696 = vst [vmem:[#allocation2] sm:$0xff] %v1664_v39   ;;  %v1684_v53 = vpack.c.bf16 %v473_v48, %v472_v47  ;;  %v477_v54 = vsub.f32 %v457_v44, %v1822_v18 }
  0x65   : > { %1697 = vst [vmem:[#allocation2 + $0x18] sm:$0xff] %v1669_v45   ;;  %v1689_v55 = vpack.c.bf16 %v475_v51, %v474_v50 }
  0x66   : > { %1698 = vst [vmem:[#allocation2 + $0x10] sm:$0xff] %v1674_v46   ;;  %v1694_v56 = vpack.c.bf16 %v477_v54, %v476_v52 }
  0x67   : > { %1699 = vst [vmem:[#allocation2 + $0x8] sm:$0xff] %v1679_v49  }
  0x68   : > { %1700 = vst [vmem:[#allocation2 + $0x20] sm:$0xff] %v1684_v53  }
  0x69   : > { %1701 = vst [vmem:[#allocation2 + $0x28] sm:$0xff] %v1689_v55  }
  0x6a   : > { %1702 = vst [vmem:[#allocation2 + $0x38] sm:$0xff] %v1694_v56  }
  0x6b PF: > { %v1531_v57 = vld [vmem:[%s2216_s10 + $0x70] sm:$0xf]  ;;  %v1637_v58 = vld [vmem:[%s2216_s10 + $0x74] sm:$0xf0]  ;;  %v1636_v59 = vld [vmem:[%s2216_s10 + $0x74] sm:$0xf] }
  0x6c   : > { %v1532_v60 = vor.u32 %v1637_v58, %v1531_v57  ;;  %v1533_v61 = vld [vmem:[%s2216_s10 + $0x78] sm:$0xf0]  ;;  %v1523_v62 = vld [vmem:[%s2216_s10 + $0x60] sm:$0xf]  ;;  %v1635_v63 = vld [vmem:[%s2216_s10 + $0x64] sm:$0xf0] }
  0x6d   : > { %v1536_v0 = vor.u32 %v1636_v59, %v1533_v61  ;;  %v1634_v1 = vld [vmem:[%s2216_s10 + $0x64] sm:$0xf]  ;;  %v1525_v2 = vld [vmem:[%s2216_s10 + $0x68] sm:$0xf0]  ;;  %v1524_v3 = vor.u32 %v1635_v63, %v1523_v62  ;;  %v1515_v5 = vld [vmem:[%s2216_s10 + $0x50] sm:$0xf] }
  0x6e   : > { %676 = vmatpush.bf16.msra.mxu0 %v1532_v60  ;;  %v1528_v4 = vor.u32 %v1634_v1, %v1525_v2  ;;  %v1633_v6 = vld [vmem:[%s2216_s10 + $0x54] sm:$0xf0]  ;;  %v1632_v7 = vld [vmem:[%s2216_s10 + $0x54] sm:$0xf]  ;;  %v1517_v8 = vld [vmem:[%s2216_s10 + $0x58] sm:$0xf0] }
  0x6f   : > { %725 = vmatpush.bf16.msra.mxu1 %v1536_v0  ;;  %v1516_v9 = vor.u32 %v1633_v6, %v1515_v5  ;;  %v1520_v10 = vor.u32 %v1632_v7, %v1517_v8  ;;  %v1507_v11 = vld [vmem:[%s2216_s10 + $0x40] sm:$0xf]  ;;  %v1631_v12 = vld [vmem:[%s2216_s10 + $0x44] sm:$0xf0]  ;;  %v1630_v13 = vld [vmem:[%s2216_s10 + $0x44] sm:$0xf] }
  0x70   : > { %v1509_v14 = vld [vmem:[%s2216_s10 + $0x48] sm:$0xf0]  ;;  %v1508_v15 = vor.u32 %v1631_v12, %v1507_v11  ;;  %v1499_v17 = vld [vmem:[%s2216_s10 + $0x30] sm:$0xf]  ;;  %v1629_v18 = vld [vmem:[%s2216_s10 + $0x34] sm:$0xf0] }
  0x71   : > { %v1512_v16 = vor.u32 %v1630_v13, %v1509_v14  ;;  %v1628_v19 = vld [vmem:[%s2216_s10 + $0x34] sm:$0xf]  ;;  %v1501_v20 = vld [vmem:[%s2216_s10 + $0x38] sm:$0xf0]  ;;  %v1500_v21 = vor.u32 %v1629_v18, %v1499_v17  ;;  %v1491_v23 = vld [vmem:[%s2216_s10 + $0x20] sm:$0xf] }
  0x72   : > { %677 = vmatpush.bf16.msra.mxu0 %v1524_v3  ;;  %v1504_v22 = vor.u32 %v1628_v19, %v1501_v20  ;;  %v1627_v24 = vld [vmem:[%s2216_s10 + $0x24] sm:$0xf0]  ;;  %v1626_v25 = vld [vmem:[%s2216_s10 + $0x24] sm:$0xf]  ;;  %v1493_v26 = vld [vmem:[%s2216_s10 + $0x28] sm:$0xf0] }
  0x73   : > { %726 = vmatpush.bf16.msra.mxu1 %v1528_v4  ;;  %v1492_v27 = vor.u32 %v1627_v24, %v1491_v23  ;;  %v1496_v28 = vor.u32 %v1626_v25, %v1493_v26  ;;  %v1483_v29 = vld [vmem:[%s2216_s10 + $0x10] sm:$0xf]  ;;  %v1625_v30 = vld [vmem:[%s2216_s10 + $0x14] sm:$0xf0]  ;;  %v1624_v31 = vld [vmem:[%s2216_s10 + $0x14] sm:$0xf] }
  0x74   : > { %v1485_v32 = vld [vmem:[%s2216_s10 + $0x18] sm:$0xf0]  ;;  %v1484_v33 = vor.u32 %v1625_v30, %v1483_v29  ;;  %v1475_v35 = vld [vmem:[%s2216_s10] sm:$0xf]  ;;  %v1623_v36 = vld [vmem:[%s2216_s10 + $0x4] sm:$0xf0] }
  0x75   : > { %v1488_v34 = vor.u32 %v1624_v31, %v1485_v32  ;;  %v1622_v37 = vld [vmem:[%s2216_s10 + $0x4] sm:$0xf]  ;;  %v1477_v38 = vld [vmem:[%s2216_s10 + $0x8] sm:$0xf0]  ;;  %v1476_v39 = vor.u32 %v1623_v36, %v1475_v35  ;;  %v1614_v41 = vld [vmem:[#allocation2 + $0x30] sm:$0xff] }
  0x76   : > { %678 = vmatpush.bf16.msra.mxu0 %v1516_v9  ;;  %v1480_v40 = vor.u32 %v1622_v37, %v1477_v38  ;;  %v1615_v42 = vld [vmem:[#allocation2] sm:$0xff]  ;;  %v1616_v43 = vld [vmem:[#allocation2 + $0x18] sm:$0xff]  ;;  %v1617_v44 = vld [vmem:[#allocation2 + $0x10] sm:$0xff] }
  0x77   : > { %727 = vmatpush.bf16.msra.mxu1 %v1520_v10  ;;  %v1618_v45 = vld [vmem:[#allocation2 + $0x8] sm:$0xff]  ;;  %v1619_v46 = vld [vmem:[#allocation2 + $0x20] sm:$0xff]  ;;  %v1645_v47 = vld [vmem:[%s2214_s14 + $0x38] sm:$0xff] }
  0x78   : > { %v1653_v48 = vld [vmem:[%s2214_s14 + $0x78] sm:$0xff]  ;;  %1046 = vmatpush.bf16.msra.mxu2 %v1645_v47  ;;  %v1644_v49 = vld [vmem:[%s2214_s14 + $0x30] sm:$0xff]  ;;  %v1643_v51 = vld [vmem:[%s2214_s14 + $0x28] sm:$0xff] }
  0x79   : > { %1095 = vmatpush.bf16.msra.mxu3 %v1653_v48  ;;  %v1652_v50 = vld [vmem:[%s2214_s14 + $0x70] sm:$0xff]  ;;  %v1651_v52 = vld [vmem:[%s2214_s14 + $0x68] sm:$0xff]  ;;  %v1642_v54 = vld [vmem:[%s2214_s14 + $0x20] sm:$0xff] }
  0x7a   : > { %679 = vmatpush.bf16.msra.mxu0 %v1508_v15  ;;  %v1620_v53 = vld [vmem:[#allocation2 + $0x28] sm:$0xff]  ;;  %v1650_v55 = vld [vmem:[%s2214_s14 + $0x60] sm:$0xff]  ;;  %v1641_v56 = vld [vmem:[%s2214_s14 + $0x18] sm:$0xff] }
  0x7b   : > { %728 = vmatpush.bf16.msra.mxu1 %v1512_v16  ;;  %v1649_v57 = vld [vmem:[%s2214_s14 + $0x58] sm:$0xff]  ;;  %v1640_v58 = vld [vmem:[%s2214_s14 + $0x10] sm:$0xff]  ;;  %v1639_v60 = vld [vmem:[%s2214_s14 + $0x8] sm:$0xff] }
  0x7c   : > { %1047 = vmatpush.bf16.msra.mxu2 %v1644_v49  ;;  %v1648_v59 = vld [vmem:[%s2214_s14 + $0x50] sm:$0xff]  ;;  %v1647_v61 = vld [vmem:[%s2214_s14 + $0x48] sm:$0xff]  ;;  %v1621_v62 = vld [vmem:[#allocation2 + $0x38] sm:$0xff] }
  0x7d   : > { %1096 = vmatpush.bf16.msra.mxu3 %v1652_v50  ;;  %v1638_v63 = vld [vmem:[%s2214_s14] sm:$0xff] }
  0x7e   : > { %680 = vmatpush.bf16.msra.mxu0 %v1500_v21  ;;  %v1646_v0 = vld [vmem:[%s2214_s14 + $0x40] sm:$0xff] }
  0x7f   : > { %729 = vmatpush.bf16.msra.mxu1 %v1504_v22  ;;  %v542_v1 = vld [vmem:[%s427_s8] sm:$0x3] }
  0x80   : > { %1048 = vmatpush.bf16.msra.mxu2 %v1643_v51  ;;  %v2297_v2 = vperm.slane %v542_v1, 0  ;;  %v2299_v3 = vperm.slane %v542_v1, 1 }
  0x81   : > { %1097 = vmatpush.bf16.msra.mxu3 %v1651_v52 }
  0x82   : > { %681 = vmatpush.bf16.msra.mxu0 %v1492_v27 }
  0x83   : > { %730 = vmatpush.bf16.msra.mxu1 %v1496_v28 }
  0x84   : > { %1049 = vmatpush.bf16.msra.mxu2 %v1642_v54 }
  0x85   : > { %1098 = vmatpush.bf16.msra.mxu3 %v1650_v55 }
  0x86   : > { %682 = vmatpush.bf16.msra.mxu0 %v1484_v33 }
  0x87   : > { %731 = vmatpush.bf16.msra.mxu1 %v1488_v34 }
  0x88   : > { %1050 = vmatpush.bf16.msra.mxu2 %v1641_v56 }
  0x89   : > { %1099 = vmatpush.bf16.msra.mxu3 %v1649_v57 }
  0x8a   : > { %683 = vmatpush.bf16.msra.mxu0 %v1476_v39 }
  0x8b   : > { %732 = vmatpush.bf16.msra.mxu1 %v1480_v40 }
  0x8c   : > { %1051 = vmatpush.bf16.msra.mxu2 %v1640_v58 }
  0x8d   : > { %684 = vmatmul.bf16.vlgmr.msra.gmra.mxu0 %v1614_v41  ;;  %1100 = vmatpush.bf16.msra.mxu3 %v1648_v59 }
  0x8e   : > { %733 = vmatmul.bf16.vlgmr.msra.gmra.mxu1 %v1614_v41 }
  0x90   : > { %1052 = vmatpush.bf16.msra.mxu2 %v1639_v60 }
  0x91   : > { %1101 = vmatpush.bf16.msra.mxu3 %v1647_v61 }
  0x94   : > { %1053 = vmatpush.bf16.msra.mxu2 %v1638_v63 }
  0x95   : > { %1102 = vmatpush.bf16.msra.mxu3 %v1646_v0 }
  0x9d   : > { %689 = vmatmul.bf16.gmra.mxu0 %v1615_v42 }
  0x9e   : > { %738 = vmatmul.bf16.gmra.mxu1 %v1615_v42 }
  0xad   : > { %694 = vmatmul.bf16.gmra.mxu0 %v1616_v43 }
  0xae   : > { %743 = vmatmul.bf16.gmra.mxu1 %v1616_v43 }
  0xbd   : > { %699 = vmatmul.bf16.gmra.mxu0 %v1617_v44 }
  0xbe   : > { %748 = vmatmul.bf16.gmra.mxu1 %v1617_v44 }
  0xcd   : > { %704 = vmatmul.bf16.gmra.mxu0 %v1618_v45 }
  0xce   : > { %753 = vmatmul.bf16.gmra.mxu1 %v1618_v45 }
  0xdd   : > { %709 = vmatmul.bf16.gmra.mxu0 %v1619_v46 }
  0xde   : > { %758 = vmatmul.bf16.gmra.mxu1 %v1619_v46 }
  0xed   : > { %714 = vmatmul.bf16.gmra.mxu0 %v1620_v53 }
  0xee   : > { %763 = vmatmul.bf16.gmra.mxu1 %v1620_v53 }
  0xfd   : > { %719 = vmatmul.bf16.gmra.mxu0 %v1621_v62 }
  0xfe   : > { %768 = vmatmul.bf16.gmra.mxu1 %v1621_v62 }
 0x10a   : > { %v685_v4 = vpop.f32.mrf.mxu0 }
 0x10b   : > { %v686_v5 = vadd.f32 %v685_v4, %v2297_v2  ;;  %v734_v6 = vpop.f32.mrf.mxu1 }
 0x10c   : > { %v735_v7 = vadd.f32 %v734_v6, %v2299_v3 }
 0x10d   : > { %v774_v8 = vmax.f32 %v686_v5, 0.0 }
 0x10e   : > { %v775_v9 = vmax.f32 %v735_v7, 0.0 }
 0x110   : > { %v806_v10 = vpack.c.bf16 %v775_v9, %v774_v8 }
 0x112   : > { %822 = vst [vmem:[%s2220_s6] sm:$0xff] %v806_v10  ;;  %v687_v11 = vpop.f32.mrf.mxu0  ;;  %v886_v19 = vunpack.c.l.b16 %v806_v10  ;;  %v887_v21 = vunpack.c.h.b16 %v806_v10 }
 0x113   : > { %v688_v12 = vadd.f32 %v687_v11, %v2297_v2  ;;  %v736_v13 = vpop.f32.mrf.mxu1 }
 0x114   : > { %v737_v14 = vadd.f32 %v736_v13, %v2299_v3 }
 0x115   : > { %v776_v15 = vmax.f32 %v688_v12, 0.0 }
 0x116   : > { %v777_v16 = vmax.f32 %v737_v14, 0.0 }
 0x118   : > { %v807_v17 = vpack.c.bf16 %v777_v16, %v776_v15 }
 0x11a   : > { %823 = vst [vmem:[%s2220_s6 + $0x8] sm:$0xff] %v807_v17  ;;  %v690_v18 = vpop.f32.mrf.mxu0  ;;  %v888_v20 = vunpack.c.l.b16 %v807_v17  ;;  %v889_v22 = vunpack.c.h.b16 %v807_v17 }
 0x11b   : > { %v691_v23 = vadd.f32 %v690_v18, %v2297_v2  ;;  %v739_v24 = vpop.f32.mrf.mxu1 }
 0x11c   : > { %v740_v25 = vadd.f32 %v739_v24, %v2299_v3  ;;  %v918_v26 = vpack.c.b16 %v888_v20, %v886_v19  ;;  %v919_v27 = vpack.c.b16 %v889_v22, %v887_v21 }
 0x11d   : > { %v778_v28 = vmax.f32 %v691_v23, 0.0 }
 0x11e   : > { %v779_v29 = vmax.f32 %v740_v25, 0.0  ;;  %1054 = vmatmul.bf16.vlgmr.msra.gmra.mxu2 %v918_v26  ;;  %1103 = vmatmul.bf16.vlgmr.msra.gmra.mxu3 %v919_v27 }
 0x120   : > { %v808_v30 = vpack.c.bf16 %v779_v29, %v778_v28 }
 0x122   : > { %824 = vst [vmem:[%s2220_s6 + $0x10] sm:$0xff] %v808_v30  ;;  %v692_v31 = vpop.f32.mrf.mxu0  ;;  %v890_v39 = vunpack.c.l.b16 %v808_v30  ;;  %v891_v41 = vunpack.c.h.b16 %v808_v30 }
 0x123   : > { %v693_v32 = vadd.f32 %v692_v31, %v2297_v2  ;;  %v741_v33 = vpop.f32.mrf.mxu1 }
 0x124   : > { %v742_v34 = vadd.f32 %v741_v33, %v2299_v3 }
 0x125   : > { %v780_v35 = vmax.f32 %v693_v32, 0.0 }
 0x126   : > { %v781_v36 = vmax.f32 %v742_v34, 0.0 }
 0x128   : > { %v809_v37 = vpack.c.bf16 %v781_v36, %v780_v35 }
 0x12a   : > { %825 = vst [vmem:[%s2220_s6 + $0x18] sm:$0xff] %v809_v37  ;;  %v695_v38 = vpop.f32.mrf.mxu0  ;;  %v892_v40 = vunpack.c.l.b16 %v809_v37  ;;  %v893_v42 = vunpack.c.h.b16 %v809_v37 }
 0x12b   : > { %v696_v43 = vadd.f32 %v695_v38, %v2297_v2  ;;  %v744_v44 = vpop.f32.mrf.mxu1 }
 0x12c   : > { %v745_v45 = vadd.f32 %v744_v44, %v2299_v3  ;;  %v920_v46 = vpack.c.b16 %v892_v40, %v890_v39  ;;  %v921_v47 = vpack.c.b16 %v893_v42, %v891_v41 }
 0x12d   : > { %v782_v48 = vmax.f32 %v696_v43, 0.0 }
 0x12e   : > { %v783_v49 = vmax.f32 %v745_v45, 0.0  ;;  %1059 = vmatmul.bf16.gmra.mxu2 %v920_v46  ;;  %1108 = vmatmul.bf16.gmra.mxu3 %v921_v47 }
 0x130   : > { %v810_v50 = vpack.c.bf16 %v783_v49, %v782_v48 }
 0x132   : > { %826 = vst [vmem:[%s2220_s6 + $0x20] sm:$0xff] %v810_v50  ;;  %v697_v51 = vpop.f32.mrf.mxu0  ;;  %v894_v59 = vunpack.c.l.b16 %v810_v50  ;;  %v895_v61 = vunpack.c.h.b16 %v810_v50 }
 0x133   : > { %v698_v52 = vadd.f32 %v697_v51, %v2297_v2  ;;  %v746_v53 = vpop.f32.mrf.mxu1 }
 0x134   : > { %v747_v54 = vadd.f32 %v746_v53, %v2299_v3 }
 0x135   : > { %v784_v55 = vmax.f32 %v698_v52, 0.0 }
 0x136   : > { %v785_v56 = vmax.f32 %v747_v54, 0.0 }
 0x138   : > { %v811_v57 = vpack.c.bf16 %v785_v56, %v784_v55 }
 0x13a   : > { %827 = vst [vmem:[%s2220_s6 + $0x28] sm:$0xff] %v811_v57  ;;  %v700_v58 = vpop.f32.mrf.mxu0  ;;  %v896_v60 = vunpack.c.l.b16 %v811_v57  ;;  %v897_v62 = vunpack.c.h.b16 %v811_v57 }
 0x13b   : > { %v701_v63 = vadd.f32 %v700_v58, %v2297_v2  ;;  %v749_v0 = vpop.f32.mrf.mxu1 }
 0x13c   : > { %v750_v1 = vadd.f32 %v749_v0, %v2299_v3  ;;  %v922_v4 = vpack.c.b16 %v896_v60, %v894_v59  ;;  %v923_v5 = vpack.c.b16 %v897_v62, %v895_v61 }
 0x13d   : > { %v786_v6 = vmax.f32 %v701_v63, 0.0 }
 0x13e   : > { %v787_v7 = vmax.f32 %v750_v1, 0.0  ;;  %1064 = vmatmul.bf16.gmra.mxu2 %v922_v4  ;;  %1113 = vmatmul.bf16.gmra.mxu3 %v923_v5 }
 0x140   : > { %v812_v8 = vpack.c.bf16 %v787_v7, %v786_v6 }
 0x142   : > { %828 = vst [vmem:[%s2220_s6 + $0x30] sm:$0xff] %v812_v8  ;;  %v702_v9 = vpop.f32.mrf.mxu0  ;;  %v898_v17 = vunpack.c.l.b16 %v812_v8  ;;  %v899_v19 = vunpack.c.h.b16 %v812_v8 }
 0x143   : > { %v703_v10 = vadd.f32 %v702_v9, %v2297_v2  ;;  %v751_v11 = vpop.f32.mrf.mxu1 }
 0x144   : > { %v752_v12 = vadd.f32 %v751_v11, %v2299_v3 }
 0x145   : > { %v788_v13 = vmax.f32 %v703_v10, 0.0 }
 0x146   : > { %v789_v14 = vmax.f32 %v752_v12, 0.0 }
 0x148   : > { %v813_v15 = vpack.c.bf16 %v789_v14, %v788_v13 }
 0x14a   : > { %829 = vst [vmem:[%s2220_s6 + $0x38] sm:$0xff] %v813_v15  ;;  %v705_v16 = vpop.f32.mrf.mxu0  ;;  %v900_v18 = vunpack.c.l.b16 %v813_v15  ;;  %v901_v20 = vunpack.c.h.b16 %v813_v15 }
 0x14b   : > { %v706_v21 = vadd.f32 %v705_v16, %v2297_v2  ;;  %v754_v22 = vpop.f32.mrf.mxu1 }
 0x14c   : > { %v755_v23 = vadd.f32 %v754_v22, %v2299_v3  ;;  %v924_v24 = vpack.c.b16 %v900_v18, %v898_v17  ;;  %v925_v25 = vpack.c.b16 %v901_v20, %v899_v19 }
 0x14d   : > { %v790_v26 = vmax.f32 %v706_v21, 0.0 }
 0x14e   : > { %v791_v27 = vmax.f32 %v755_v23, 0.0  ;;  %1069 = vmatmul.bf16.gmra.mxu2 %v924_v24  ;;  %1118 = vmatmul.bf16.gmra.mxu3 %v925_v25 }
 0x150   : > { %v814_v28 = vpack.c.bf16 %v791_v27, %v790_v26 }
 0x152   : > { %830 = vst [vmem:[%s2220_s6 + $0x40] sm:$0xff] %v814_v28  ;;  %v707_v29 = vpop.f32.mrf.mxu0  ;;  %v902_v37 = vunpack.c.l.b16 %v814_v28  ;;  %v903_v39 = vunpack.c.h.b16 %v814_v28 }
 0x153   : > { %v708_v30 = vadd.f32 %v707_v29, %v2297_v2  ;;  %v756_v31 = vpop.f32.mrf.mxu1 }
 0x154   : > { %v757_v32 = vadd.f32 %v756_v31, %v2299_v3 }
 0x155   : > { %v792_v33 = vmax.f32 %v708_v30, 0.0 }
 0x156   : > { %v793_v34 = vmax.f32 %v757_v32, 0.0 }
 0x158   : > { %v815_v35 = vpack.c.bf16 %v793_v34, %v792_v33 }
 0x15a   : > { %831 = vst [vmem:[%s2220_s6 + $0x48] sm:$0xff] %v815_v35  ;;  %v710_v36 = vpop.f32.mrf.mxu0  ;;  %v904_v38 = vunpack.c.l.b16 %v815_v35  ;;  %v905_v40 = vunpack.c.h.b16 %v815_v35 }
 0x15b   : > { %v711_v41 = vadd.f32 %v710_v36, %v2297_v2  ;;  %v759_v42 = vpop.f32.mrf.mxu1 }
 0x15c   : > { %v760_v43 = vadd.f32 %v759_v42, %v2299_v3  ;;  %v926_v44 = vpack.c.b16 %v904_v38, %v902_v37  ;;  %v927_v45 = vpack.c.b16 %v905_v40, %v903_v39 }
 0x15d   : > { %v794_v46 = vmax.f32 %v711_v41, 0.0 }
 0x15e   : > { %v795_v47 = vmax.f32 %v760_v43, 0.0  ;;  %1074 = vmatmul.bf16.gmra.mxu2 %v926_v44  ;;  %1123 = vmatmul.bf16.gmra.mxu3 %v927_v45 }
 0x160   : > { %v816_v48 = vpack.c.bf16 %v795_v47, %v794_v46 }
 0x162   : > { %832 = vst [vmem:[%s2220_s6 + $0x50] sm:$0xff] %v816_v48  ;;  %v712_v49 = vpop.f32.mrf.mxu0  ;;  %v906_v57 = vunpack.c.l.b16 %v816_v48  ;;  %v907_v59 = vunpack.c.h.b16 %v816_v48 }
 0x163   : > { %v713_v50 = vadd.f32 %v712_v49, %v2297_v2  ;;  %v761_v51 = vpop.f32.mrf.mxu1 }
 0x164   : > { %v762_v52 = vadd.f32 %v761_v51, %v2299_v3 }
 0x165   : > { %v796_v53 = vmax.f32 %v713_v50, 0.0 }
 0x166   : > { %v797_v54 = vmax.f32 %v762_v52, 0.0 }
 0x168   : > { %v817_v55 = vpack.c.bf16 %v797_v54, %v796_v53 }
 0x16a   : > { %833 = vst [vmem:[%s2220_s6 + $0x58] sm:$0xff] %v817_v55  ;;  %v715_v56 = vpop.f32.mrf.mxu0  ;;  %v908_v58 = vunpack.c.l.b16 %v817_v55  ;;  %v909_v60 = vunpack.c.h.b16 %v817_v55 }
 0x16b   : > { %v716_v61 = vadd.f32 %v715_v56, %v2297_v2  ;;  %v764_v62 = vpop.f32.mrf.mxu1 }
 0x16c   : > { %v765_v63 = vadd.f32 %v764_v62, %v2299_v3  ;;  %v928_v0 = vpack.c.b16 %v908_v58, %v906_v57  ;;  %v929_v1 = vpack.c.b16 %v909_v60, %v907_v59 }
 0x16d   : > { %v798_v4 = vmax.f32 %v716_v61, 0.0 }
 0x16e   : > { %v799_v5 = vmax.f32 %v765_v63, 0.0  ;;  %1079 = vmatmul.bf16.gmra.mxu2 %v928_v0  ;;  %1128 = vmatmul.bf16.gmra.mxu3 %v929_v1 }
 0x170   : > { %v818_v6 = vpack.c.bf16 %v799_v5, %v798_v4 }
 0x172   : > { %834 = vst [vmem:[%s2220_s6 + $0x60] sm:$0xff] %v818_v6  ;;  %v717_v7 = vpop.f32.mrf.mxu0  ;;  %v910_v15 = vunpack.c.l.b16 %v818_v6  ;;  %v911_v17 = vunpack.c.h.b16 %v818_v6 }
 0x173   : > { %v718_v8 = vadd.f32 %v717_v7, %v2297_v2  ;;  %v766_v9 = vpop.f32.mrf.mxu1 }
 0x174   : > { %v767_v10 = vadd.f32 %v766_v9, %v2299_v3 }
 0x175   : > { %v800_v11 = vmax.f32 %v718_v8, 0.0 }
 0x176   : > { %v801_v12 = vmax.f32 %v767_v10, 0.0 }
 0x178   : > { %v819_v13 = vpack.c.bf16 %v801_v12, %v800_v11  ;;  %v1144_v12 = vld [vmem:[%s2558_s1] sm:$0x1] }
 0x17a   : > { %835 = vst [vmem:[%s2220_s6 + $0x68] sm:$0xff] %v819_v13  ;;  %v720_v14 = vpop.f32.mrf.mxu0  ;;  %v912_v16 = vunpack.c.l.b16 %v819_v13  ;;  %v913_v18 = vunpack.c.h.b16 %v819_v13 }
 0x17b   : > { %v721_v19 = vadd.f32 %v720_v14, %v2297_v2  ;;  %v769_v20 = vpop.f32.mrf.mxu1 }
 0x17c   : > { %v770_v21 = vadd.f32 %v769_v20, %v2299_v3  ;;  %v930_v22 = vpack.c.b16 %v912_v16, %v910_v15  ;;  %v931_v23 = vpack.c.b16 %v913_v18, %v911_v17 }
 0x17d   : > { %v802_v24 = vmax.f32 %v721_v19, 0.0 }
 0x17e   : > { %v803_v25 = vmax.f32 %v770_v21, 0.0  ;;  %1084 = vmatmul.bf16.gmra.mxu2 %v930_v22  ;;  %1133 = vmatmul.bf16.gmra.mxu3 %v931_v23 }
 0x180   : > { %v820_v26 = vpack.c.bf16 %v803_v25, %v802_v24 }
 0x182   : > { %836 = vst [vmem:[%s2220_s6 + $0x70] sm:$0xff] %v820_v26  ;;  %v722_v27 = vpop.f32.mrf.mxu0  ;;  %v914_v34 = vunpack.c.l.b16 %v820_v26  ;;  %v915_v36 = vunpack.c.h.b16 %v820_v26 }
 0x183   : > { %v723_v28 = vadd.f32 %v722_v27, %v2297_v2  ;;  %v771_v29 = vpop.f32.mrf.mxu1 }
 0x184   : > { %v772_v30 = vadd.f32 %v771_v29, %v2299_v3 }
 0x185   : > { %v804_v31 = vmax.f32 %v723_v28, 0.0 }
 0x186   : > { %v805_v32 = vmax.f32 %v772_v30, 0.0 }
 0x188   : > { %v821_v33 = vpack.c.bf16 %v805_v32, %v804_v31 }
 0x18a   : > { %837 = vst [vmem:[%s2220_s6 + $0x78] sm:$0xff] %v821_v33  ;;  %v916_v35 = vunpack.c.l.b16 %v821_v33  ;;  %v917_v37 = vunpack.c.h.b16 %v821_v33 }
 0x18c   : > { %v932_v38 = vpack.c.b16 %v916_v35, %v914_v34  ;;  %v933_v39 = vpack.c.b16 %v917_v37, %v915_v36 }
 0x18e   : > { %1089 = vmatmul.bf16.gmra.mxu2 %v932_v38  ;;  %1138 = vmatmul.bf16.gmra.mxu3 %v933_v39 }
 0x1a1   : > { %v1055_v40 = vpop.f32.mrf.mxu2  ;;  %v1104_v41 = vpop.f32.mrf.mxu3 }
 0x1a2   : > { %v2349_v42 = vadd.f32 %v1104_v41, %v1055_v40 }
 0x1a9   : > { %v1057_v2 = vpop.f32.mrf.mxu2  ;;  %v1106_v43 = vpop.f32.mrf.mxu3 }
 0x1aa   : > { %v2351_v44 = vadd.f32 %v1106_v43, %v1057_v2 }
 0x1b1   : > { %v1060_v3 = vpop.f32.mrf.mxu2  ;;  %v1109_v45 = vpop.f32.mrf.mxu3 }
 0x1b2   : > { %v2353_v46 = vadd.f32 %v1109_v45, %v1060_v3 }
 0x1b9   : > { %v1062_v47 = vpop.f32.mrf.mxu2  ;;  %v1111_v48 = vpop.f32.mrf.mxu3 }
 0x1ba   : > { %v2355_v49 = vadd.f32 %v1111_v48, %v1062_v47 }
 0x1c1   : > { %v1065_v50 = vpop.f32.mrf.mxu2  ;;  %v1114_v51 = vpop.f32.mrf.mxu3 }
 0x1c2   : > { %v2357_v52 = vadd.f32 %v1114_v51, %v1065_v50 }
 0x1c9   : > { %v1067_v53 = vpop.f32.mrf.mxu2  ;;  %v1116_v54 = vpop.f32.mrf.mxu3 }
 0x1ca   : > { %v2359_v55 = vadd.f32 %v1116_v54, %v1067_v53 }
 0x1d1   : > { %v1070_v56 = vpop.f32.mrf.mxu2  ;;  %v1119_v57 = vpop.f32.mrf.mxu3 }
 0x1d2   : > { %v2361_v58 = vadd.f32 %v1119_v57, %v1070_v56 }
 0x1d9   : > { %v1072_v59 = vpop.f32.mrf.mxu2  ;;  %v1121_v60 = vpop.f32.mrf.mxu3 }
 0x1da   : > { %v2363_v61 = vadd.f32 %v1121_v60, %v1072_v59 }
 0x1e1   : > { %v1075_v62 = vpop.f32.mrf.mxu2  ;;  %v1124_v63 = vpop.f32.mrf.mxu3 }
 0x1e2   : > { %v2365_v0 = vadd.f32 %v1124_v63, %v1075_v62 }
 0x1e9   : > { %v1077_v1 = vpop.f32.mrf.mxu2  ;;  %v1126_v4 = vpop.f32.mrf.mxu3 }
 0x1ea   : > { %v2367_v5 = vadd.f32 %v1126_v4, %v1077_v1 }
 0x1f1   : > { %v1080_v6 = vpop.f32.mrf.mxu2  ;;  %v1129_v7 = vpop.f32.mrf.mxu3 }
 0x1f2   : > { %v2369_v8 = vadd.f32 %v1129_v7, %v1080_v6 }
 0x1f9   : > { %v1082_v9 = vpop.f32.mrf.mxu2  ;;  %v1131_v10 = vpop.f32.mrf.mxu3 }
 0x1fa   : > { %v2371_v11 = vadd.f32 %v1131_v10, %v1082_v9 }
 0x201   : > { %v1085_v13 = vpop.f32.mrf.mxu2  ;;  %v1134_v14 = vpop.f32.mrf.mxu3 }
 0x202   : > { %v2376_v15 = vadd.f32 %v1134_v14, %v1085_v13 }
 0x209   : > { %v1087_v16 = vpop.f32.mrf.mxu2  ;;  %v1136_v17 = vpop.f32.mrf.mxu3 }
 0x20a   : > { %v2378_v18 = vadd.f32 %v1136_v17, %v1087_v16 }
 0x211   : > { %v1090_v19 = vpop.f32.mrf.mxu2  ;;  %v1139_v20 = vpop.f32.mrf.mxu3 }
 0x212   : > { %v2380_v21 = vadd.f32 %v1139_v20, %v1090_v19 }
 0x216   : > { %1147 = sbr.rel (%p1440_p13) target bundleno = 559 (0x22f), region = 86 }
 0x219   : > { %v1092_v22 = vpop.f32.mrf.mxu2  ;;  %v1141_v23 = vpop.f32.mrf.mxu3 }
 0x21a   : > { %v2382_v24 = vadd.f32 %v1141_v23, %v1092_v22 }
 0x21b   : > { %v1149_v25 = vperm.slane %v1144_v12, 0 }
 0x21d   : > { %v1151_v26 = vadd.f32 %v1149_v25, %v2349_v42  ;;  %v1152_v27 = vadd.f32 %v1149_v25, %v2351_v44  ;;  %v1153_v28 = vadd.f32 %v1149_v25, %v2353_v46  ;;  %v1154_v29 = vadd.f32 %v1149_v25, %v2355_v49 }
 0x21e   : > { %v1155_v30 = vadd.f32 %v1149_v25, %v2357_v52  ;;  %v1156_v31 = vadd.f32 %v1149_v25, %v2359_v55  ;;  %v1157_v32 = vadd.f32 %v1149_v25, %v2361_v58  ;;  %v1158_v33 = vadd.f32 %v1149_v25, %v2363_v61 }
 0x21f   : > { %1167 = vst [vmem:[%s2218_s24] sm:$0xff] %v1151_v26  ;;  %v1159_v34 = vadd.f32 %v1149_v25, %v2365_v0  ;;  %v1160_v35 = vadd.f32 %v1149_v25, %v2367_v5  ;;  %v1161_v36 = vadd.f32 %v1149_v25, %v2369_v8  ;;  %v1162_v37 = vadd.f32 %v1149_v25, %v2371_v11 }
 0x220   : > { %1168 = vst [vmem:[%s2218_s24 + $0x8] sm:$0xff] %v1152_v27  ;;  %v1163_v38 = vadd.f32 %v1149_v25, %v2376_v15  ;;  %v1164_v39 = vadd.f32 %v1149_v25, %v2378_v18  ;;  %v1165_v40 = vadd.f32 %v1149_v25, %v2380_v21  ;;  %v1166_v41 = vadd.f32 %v1149_v25, %v2382_v24 }
 0x221   : > { %1169 = vst [vmem:[%s2218_s24 + $0x10] sm:$0xff] %v1153_v28 }
 0x222   : > { %1170 = vst [vmem:[%s2218_s24 + $0x18] sm:$0xff] %v1154_v29 }
 0x223   : > { %1171 = vst [vmem:[%s2218_s24 + $0x20] sm:$0xff] %v1155_v30 }
 0x224   : > { %1172 = vst [vmem:[%s2218_s24 + $0x28] sm:$0xff] %v1156_v31 }
 0x225   : > { %1173 = vst [vmem:[%s2218_s24 + $0x30] sm:$0xff] %v1157_v32 }
 0x226   : > { %1174 = vst [vmem:[%s2218_s24 + $0x38] sm:$0xff] %v1158_v33 }
 0x227   : > { %1175 = vst [vmem:[%s2218_s24 + $0x40] sm:$0xff] %v1159_v34 }
 0x228   : > { %1176 = vst [vmem:[%s2218_s24 + $0x48] sm:$0xff] %v1160_v35 }
 0x229   : > { %1177 = vst [vmem:[%s2218_s24 + $0x50] sm:$0xff] %v1161_v36 }
 0x22a   : > { %1178 = vst [vmem:[%s2218_s24 + $0x58] sm:$0xff] %v1162_v37 }
 0x22b   : > { %1179 = vst [vmem:[%s2218_s24 + $0x60] sm:$0xff] %v1163_v38 }
 0x22c   : > { %1180 = vst [vmem:[%s2218_s24 + $0x68] sm:$0xff] %v1164_v39 }
 0x22d   : > { %1181 = vst [vmem:[%s2218_s24 + $0x70] sm:$0xff] %v1165_v40 }
 0x22e   : > { %1182 = vst [vmem:[%s2218_s24 + $0x78] sm:$0xff] %v1166_v41 }
 0x22f PF: > { %p1602_p0 = scmp.eq.s32.totalorder %s1973_s29, 0 }
 0x231   : > { %1186 = sbr.rel (%p1602_p0) target bundleno = 585 (0x249), region = 90 }
 0x236   : > { %v1187_v2 = vld [vmem:[%s2218_s24] sm:$0xff]  ;;  %v1188_v43 = vld [vmem:[%s2218_s24 + $0x8] sm:$0xff]  ;;  %v1189_v3 = vld [vmem:[%s2218_s24 + $0x10] sm:$0xff] }
 0x237   : > { %v1203_v45 = vadd.f32 %v1187_v2, %v2349_v42  ;;  %v1204_v47 = vadd.f32 %v1188_v43, %v2351_v44  ;;  %v1205_v48 = vadd.f32 %v1189_v3, %v2353_v46  ;;  %v1190_v50 = vld [vmem:[%s2218_s24 + $0x18] sm:$0xff]  ;;  %v1191_v51 = vld [vmem:[%s2218_s24 + $0x20] sm:$0xff]  ;;  %v1192_v53 = vld [vmem:[%s2218_s24 + $0x28] sm:$0xff] }
 0x238   : > { %v1206_v54 = vadd.f32 %v1190_v50, %v2355_v49  ;;  %v1193_v56 = vld [vmem:[%s2218_s24 + $0x30] sm:$0xff]  ;;  %v1207_v57 = vadd.f32 %v1191_v51, %v2357_v52  ;;  %v1194_v42 = vld [vmem:[%s2218_s24 + $0x38] sm:$0xff]  ;;  %v1208_v44 = vadd.f32 %v1192_v53, %v2359_v55  ;;  %v1195_v46 = vld [vmem:[%s2218_s24 + $0x40] sm:$0xff] }
 0x239   : > { %1219 = vst [vmem:[%s2218_s24] sm:$0xff] %v1203_v45  ;;  %v1209_v59 = vadd.f32 %v1193_v56, %v2361_v58  ;;  %v1196_v49 = vld [vmem:[%s2218_s24 + $0x48] sm:$0xff]  ;;  %v1210_v60 = vadd.f32 %v1194_v42, %v2363_v61  ;;  %v1197_v52 = vld [vmem:[%s2218_s24 + $0x50] sm:$0xff]  ;;  %v1211_v62 = vadd.f32 %v1195_v46, %v2365_v0  ;;  %v1198_v55 = vld [vmem:[%s2218_s24 + $0x58] sm:$0xff] }
 0x23a   : > { %1220 = vst [vmem:[%s2218_s24 + $0x8] sm:$0xff] %v1204_v47  ;;  %v1212_v63 = vadd.f32 %v1196_v49, %v2367_v5  ;;  %v1199_v1 = vld [vmem:[%s2218_s24 + $0x60] sm:$0xff]  ;;  %v1213_v58 = vadd.f32 %v1197_v52, %v2369_v8  ;;  %v1200_v61 = vld [vmem:[%s2218_s24 + $0x68] sm:$0xff]  ;;  %v1214_v4 = vadd.f32 %v1198_v55, %v2371_v11  ;;  %v1201_v6 = vld [vmem:[%s2218_s24 + $0x70] sm:$0xff] }
 0x23b   : > { %1221 = vst [vmem:[%s2218_s24 + $0x10] sm:$0xff] %v1205_v48  ;;  %v1215_v0 = vadd.f32 %v1199_v1, %v2376_v15  ;;  %v1202_v7 = vld [vmem:[%s2218_s24 + $0x78] sm:$0xff]  ;;  %v1216_v5 = vadd.f32 %v1200_v61, %v2378_v18  ;;  %v1217_v9 = vadd.f32 %v1201_v6, %v2380_v21 }
 0x23c   : > { %1222 = vst [vmem:[%s2218_s24 + $0x18] sm:$0xff] %v1206_v54  ;;  %v1218_v8 = vadd.f32 %v1202_v7, %v2382_v24 }
 0x23d   : > { %1223 = vst [vmem:[%s2218_s24 + $0x20] sm:$0xff] %v1207_v57 }
 0x23e   : > { %1224 = vst [vmem:[%s2218_s24 + $0x28] sm:$0xff] %v1208_v44 }
 0x23f   : > { %1225 = vst [vmem:[%s2218_s24 + $0x30] sm:$0xff] %v1209_v59 }
 0x240   : > { %1226 = vst [vmem:[%s2218_s24 + $0x38] sm:$0xff] %v1210_v60 }
 0x241   : > { %1227 = vst [vmem:[%s2218_s24 + $0x40] sm:$0xff] %v1211_v62 }
 0x242   : > { %1228 = vst [vmem:[%s2218_s24 + $0x48] sm:$0xff] %v1212_v63 }
 0x243   : > { %1229 = vst [vmem:[%s2218_s24 + $0x50] sm:$0xff] %v1213_v58 }
 0x244   : > { %1230 = vst [vmem:[%s2218_s24 + $0x58] sm:$0xff] %v1214_v4 }
 0x245   : > { %1231 = vst [vmem:[%s2218_s24 + $0x60] sm:$0xff] %v1215_v0 }
 0x246   : > { %1232 = vst [vmem:[%s2218_s24 + $0x68] sm:$0xff] %v1216_v5 }
 0x247   : > { %1233 = vst [vmem:[%s2218_s24 + $0x70] sm:$0xff] %v1217_v9 }
 0x248   : > { %1234 = vst [vmem:[%s2218_s24 + $0x78] sm:$0xff] %v1218_v8 }
 0x249 PF: > { %s1654_s29 = sshll.u32 %s1977_s30, 7  ;;  %s1253_s17 = sshll.u32 %s2218_s24, 4  ;;  %s1254_s17 = int_to_ptr.vmem [resolvable:$true] %s1253_s17 }
 0x24a   : > { %s1252_s13 = scalar_lea.hbm %s2562_s5, %s1654_s29  ;;  %s2603_s20 = sand.u32 1, %s1957_s25  }
 0x24b   : > { %s1255_s19 = sshll.u32 %s1252_s13, 4  ;;  %s1236_s16 = scalar_lea.sflag [#allocation5], %s2603_s20  ;;  %s1256_s19 = int_to_ptr.hbm [resolvable:$true] %s1255_s19 }
 0x24c   : > { %s1837_s27 = sshra.s32 %s1256_s19, 4  ;;  %s1843_s23 = scalar_lea.hbm %s2562_s5, 256  ;;  %s1838_s27 = int_to_ptr.hbm [resolvable:$true] %s1837_s27 }
 0x24d   : > { %s1839_s15 = scalar_lea.hbm %s1838_s27, 128  ;;  %p1844_p6 = scmp.lt.s32.totalorder %s1838_s27, %s2562_s5 }
 0x24e   : > { %p1840_p1 = scmp.ne.s32.totalorder %s1838_s27, %s1839_s15  ;;  %p1845_p7 = scmp.lt.s32.totalorder %s1843_s23, %s1839_s15 }
 0x250   : > { %p1841_p5 = pnand %p1840_p1, %p2129_p10  ;;  %p1846_p8 = por %p1845_p7, %p1844_p6 }
 0x252   : > { %p1842_p3 = pneg %p1841_p5 }
 0x254   : > { %p1847_p9 = pnand %p1846_p8, %p1842_p3 }
 0x256   : > { %1850 = shalt.err (!%p1847_p9)
}
 0x257   : > { %s1991_s24 = smov 128   ;;  %s1992_s7 = smov 8  }
 0x258   : > { %1703 = dma.vmem_to_hbm [thread:$0]  (%p2129_p10), %s1254_s17, 2048, %s1256_s19, %s1236_s16, %s1991_s24, %s1991_s24, %s1992_s7  }
 0x259   : > { %s1655_s8 = sshll.u32 %s1977_s30, 6  ;;  %s1273_s29 = sshll.u32 %s2220_s6, 4  ;;  %s1274_s29 = int_to_ptr.vmem [resolvable:$true] %s1273_s29 }
 0x25a   : > { %s1270_s14 = sadd.s32 %s1655_s8, %s2195_s2  ;;  %s2604_s27 = sld [smem:[#allocation26_spill]] }
 0x25b   : > { %s1610_s11 = sshll.u32 %s1270_s14, 2  ;;  %s2606_s23 = sand.u32 1, %s1945_s22  }
 0x25c   : > { %s1241_s26 = scalar_lea.sflag [#allocation7], %s2606_s23 }
 0x260   : > { %s2605_s15 = smov %s2604_s27  ;;  %s1272_s10 = scalar_lea.hbm %s2604_s27, %s1610_s11 }
 0x261   : > { %s1275_s21 = sshll.u32 %s1272_s10, 4  ;;  %s1871_s2 = scalar_lea.hbm %s2605_s15, 512  ;;  %s1276_s21 = int_to_ptr.hbm [resolvable:$true] %s1275_s21 }
 0x262   : > { %s1865_s28 = sshra.s32 %s1276_s21, 4  ;;  %s1866_s28 = int_to_ptr.hbm [resolvable:$true] %s1865_s28 }
 0x263   : > { %s1867_s0 = scalar_lea.hbm %s1866_s28, 128  ;;  %p1872_p0 = scmp.lt.s32.totalorder %s1866_s28, %s2605_s15 }
 0x264   : > { %p1868_p11 = scmp.ne.s32.totalorder %s1866_s28, %s1867_s0  ;;  %p1873_p1 = scmp.lt.s32.totalorder %s1871_s2, %s1867_s0 }
 0x266   : > { %p1869_p13 = pnand %p1868_p11, %p2150_p2  ;;  %p1874_p5 = por %p1873_p1, %p1872_p0 }
 0x268   : > { %p1870_p10 = pneg %p1869_p13 }
 0x26a   : > { %p1875_p3 = pnand %p1874_p5, %p1870_p10 }
 0x26c   : > { %1878 = shalt.err (!%p1875_p3)
}
 0x26d   : > { %s1993_s19 = smov 256  }
 0x26e   : > { %1704 = dma.vmem_to_hbm [thread:$0]  (%p2150_p2), %s1274_s29, 2048, %s1276_s21, %s1241_s26, %s1991_s24, %s1993_s19, %s1992_s7  }
 0x26f PF: > { %s2607_s16 = sld [smem:[#allocation12_spill]]  ;;  %p1714_p6 = scmp.ge.s32.totalorder %s1989_s9, 2 }
 0x271   : > { %p1708_p7 = pnand %p1714_p6, %p2136_p12 }
 0x273   : > { %p1709_p8 = pneg %p1708_p7 }
 0x275   : > { %s1290_s14 = sand.u32 1, %s2607_s16  }
 0x276   : > { %s1291_s11 = scalar_lea.sflag [#allocation5], %s1290_s14 }
 0x277   : > { %1932 = dma.done.wait (%p1709_p8), %s1291_s11, 2048  }
 0x278   : > { %1934 = vsyncadd (%p1709_p8), %s1291_s11, 4294965248  ;;  %s2609_s0 = sld [smem:[#allocation10_spill]]  ;;  %p1711_p9 = pnand %p1714_p6, %p2154_p4 }
 0x27a   : > { %p1712_p11 = pneg %p1711_p9 }
 0x27e   : > { %s1300_s20 = sand.u32 1, %s2609_s0  }
 0x27f   : > { %s1301_s18 = scalar_lea.sflag [#allocation7], %s1300_s20 }
 0x280   : > { %1936 = dma.done.wait (%p1712_p11), %s1301_s18, 2048  }
 0x281   : > { %1938 = vsyncadd (%p1712_p11), %s1301_s18, 4294965248  ;;  %s23_s9 = sadd.s32 1, %s1989_s9   ;;  %s2612_s7 = sld [smem:[#allocation11_spill]] }
 0x282   : > { %p2513_p2 = scmp.ge.s32.totalorder %s23_s9, 6   ;;  %s2613_s23 = sld [smem:[#allocation22_spill]] }
 0x283   : > { %s2614_s29 = sld [smem:[#allocation13_spill]]  ;;  %s2623_s21 = smov %s1945_s22 }
 0x284   : > { %s2615_s26 = sld [smem:[#allocation20_spill]]  ;;  %s2625_s24 = smov %s1957_s25 }
 0x285   : > { %s2616_s27 = sld [smem:[#allocation14_spill]] }
 0x286   : > { %s2617_s28 = sld [smem:[#allocation19_spill]] }
 0x287   : > { %s2618_s10 = sld [smem:[#allocation15_spill]]  ;;  %s2624_s22 = smov %s2612_s7 }
 0x288   : > { %s2619_s30 = sld [smem:[#allocation16_spill]] }
 0x289   : > { %s2620_s12 = sld [smem:[#allocation17_spill]]  ;;  %s2626_s25 = smov %s2614_s29 }
 0x28a   : > { %s2621_s8 = sld [smem:[#allocation18_spill]] }
 0x28b   :  { %22 = sbr.rel (!%p2513_p2) target bundleno = 14 (0xe), region = 156 }
 0x28d   : > { %s2627_s29 = smov %s2618_s10 }
 0x28f   : > { %s2628_s7 = smov %s2620_s12 }
 0x290   :  { %1307 = vsyncpa [#allocation5], 1 }
 0x291   :  { %1309 = vsyncpa [#allocation5 + $0x1], 1 }
 0x292   :  { %1310 = vsyncpa [#allocation7], 1 }
 0x293   :  { %1312 = vsyncpa [#allocation7 + $0x1], 1 }

</bundles_post_ra>
